<compile_context>
chip_gen: v6e
topology: v6e:2x2x1
jax: 0.10.0
libtpu: 0.0.40
codegen_flags: <defaults>
</compile_context>

<pallas_src>
import warnings

import jax
import jax.numpy as jnp
from jax.experimental import pallas as pl
from jax.experimental.pallas import tpu as pltpu


# ----------------------------------------------------------------------------
# Kernels
# ----------------------------------------------------------------------------
def _ffn_kernel_resident(x_ref, w1_ref, b_ref, w2_ref, o_ref):
    """Fully-resident-weights FFN tile.

    x_ref: (tm, H) native dtype; w1/w2: (H, H) MXU dtype;
    b_ref: (2, H) f32 with row0 = b1, row1 = b2; o_ref: (tm, H) input dtype.
    """
    h = jnp.dot(x_ref[...].astype(w1_ref.dtype), w1_ref[...],
                preferred_element_type=jnp.float32)
    h = jnp.maximum(h + b_ref[0:1, :], 0.0)                  # bias + ReLU in f32
    y = jnp.dot(h.astype(w2_ref.dtype), w2_ref[...],
                preferred_element_type=jnp.float32)
    # Residual: re-read x_ref here (cheap vld) so a wide f32 copy of x is not
    # live across both matmuls (less spill pressure at large tm).
    o_ref[...] = (y + b_ref[1:2, :]
                  + x_ref[...].astype(jnp.float32)).astype(o_ref.dtype)


def _ffn_kernel_ktiled(x_ref, w1_ref, b1_ref, w2_ref, b2_ref, o_ref, acc_ref):
    """Hidden-dim-tiled FFN: grid = (row tiles, hidden chunks), reduction last.

    x_ref: (tm, H); w1_ref: (H, tk); b1_ref: (1, tk); w2_ref: (tk, H);
    b2_ref: (1, H); acc_ref: (tm, H) f32 scratch.
    """
    k = pl.program_id(1)

    @pl.when(k == 0)
    def _init():
        acc_ref[...] = x_ref[...].astype(jnp.float32) + b2_ref[...]

    h = jnp.dot(x_ref[...].astype(w1_ref.dtype), w1_ref[...],
                preferred_element_type=jnp.float32)
    h = jnp.maximum(h + b1_ref[...], 0.0)                    # per-chunk bias + ReLU
    acc_ref[...] += jnp.dot(h.astype(w2_ref.dtype), w2_ref[...],
                            preferred_element_type=jnp.float32)

    @pl.when(k == pl.num_programs(1) - 1)
    def _finalize():
        o_ref[...] = acc_ref[...].astype(o_ref.dtype)


# ----------------------------------------------------------------------------
# Helpers
# ----------------------------------------------------------------------------
def _round_up(n, m):
    return ((n + m - 1) // m) * m


def _vmem_capacity_bytes():
    """Per-core VMEM capacity, used ONLY for tile-size / vmem-limit heuristics.

    Falls back to the most conservative per-core figure (v7x: 64 MiB) if the
    hardware probe is unavailable; never affects correctness or error paths.
    """
    if hasattr(pltpu, "get_tpu_info"):
        try:
            cap = getattr(pltpu.get_tpu_info(), "vmem_capacity_bytes", None)
            if cap:
                return int(cap)
        except Exception:  # hardware probe only
            pass
    return 64 << 20


def _single_buffer_kwargs():
    """pipeline_mode=pl.Buffered(1) kwargs for grid-constant operands.

    Halves their VMEM reservation (matters on v7x's 64 MiB).  Feature-detected:
    only a missing pl.Buffered or a constructor-level TypeError (older Pallas
    without pipeline_mode) downgrades to the default double-buffered spec.
    """
    if not hasattr(pl, "Buffered"):
        return {}
    try:
        pl.BlockSpec((8, 128), lambda i: (0, 0), pipeline_mode=pl.Buffered(1))
    except TypeError:
        return {}
    return {"pipeline_mode": pl.Buffered(1)}


def _call_with_weight_buffering(build, args):
    """Run the kernel, preferring single-buffered grid-constant weight specs.

    Not a silent catch-all: if the Buffered(1) variant fails we warn with the
    original error and retry the plain (double-buffered) variant; if that also
    fails the ORIGINAL error is re-raised, so real bugs (shape mistakes, VMEM
    OOM) always surface.
    """
    wkw = _single_buffer_kwargs()
    if not wkw:
        return build({})(*args)
    try:
        return build(wkw)(*args)
    except Exception as err:  # downgraded only if the plain variant succeeds
        warnings.warn(
            "pl.Buffered(1) weight specs failed "
            f"({type(err).__name__}: {err}); retrying with default "
            "double-buffered specs.",
            RuntimeWarning,
        )
        try:
            return build({})(*args)
        except Exception:
            raise err


# ----------------------------------------------------------------------------
# pallas_call builders
# ----------------------------------------------------------------------------
def _resident_call(x2d, w1, b1f, b2f, w2, *, tm, vmem_budget, cost):
    M, H = x2d.shape
    x_item = x2d.dtype.itemsize
    w_item = w1.dtype.itemsize
    b_stack = jnp.concatenate([b1f, b2f], axis=0)   # (2, H) f32 -> one DMA/buffer

    def build(wkw):
        n_wbuf = 1 if wkw else 2
        vmem_est = (4 * tm * H * x_item               # x/out double-buffered
                    + n_wbuf * 2 * H * H * w_item     # resident w1 + w2
                    + 3 * tm * H * 4                  # f32 intermediates
                    + (2 << 20))                      # headroom
        vmem_limit = int(min(max(vmem_est, 16 << 20), vmem_budget))
        return pl.pallas_call(
            _ffn_kernel_resident,
            out_shape=jax.ShapeDtypeStruct((M, H), x2d.dtype),
            grid_spec=pltpu.PrefetchScalarGridSpec(
                num_scalar_prefetch=0,
                grid=(pl.cdiv(M, tm),),
                in_specs=[
                    pl.BlockSpec((tm, H), lambda i: (i, 0)),         # x rows
                    pl.BlockSpec((H, H), lambda i: (0, 0), **wkw),   # w1 (resident)
                    pl.BlockSpec((2, H), lambda i: (0, 0), **wkw),   # [b1; b2]
                    pl.BlockSpec((H, H), lambda i: (0, 0), **wkw),   # w2 (resident)
                ],
                out_specs=pl.BlockSpec((tm, H), lambda i: (i, 0)),
            ),
            compiler_params=pltpu.CompilerParams(
                dimension_semantics=("parallel",),
                vmem_limit_bytes=vmem_limit,
            ),
            cost_estimate=cost,
        )

    return _call_with_weight_buffering(build, (x2d, w1, b_stack, w2))


def _ktiled_call(x2d, w1, b1f, w2, b2f, *, tm, tk, vmem_budget, cost):
    M, H = x2d.shape
    x_item = x2d.dtype.itemsize
    w_item = w1.dtype.itemsize

    def build(wkw):
        vmem_est = (4 * tm * H * x_item                   # x/out double-buffered
                    + 2 * (H * tk + tk * H) * w_item      # w1/w2 k-chunks, 2 buffers
                    + tm * H * 4                          # f32 accumulator scratch
                    + tm * tk * 4 + tm * H * 4            # f32 intermediates
                    + (2 << 20))
        vmem_limit = int(min(max(vmem_est, 16 << 20), vmem_budget))
        return pl.pallas_call(
            _ffn_kernel_ktiled,
            out_shape=jax.ShapeDtypeStruct((M, H), x2d.dtype),
            grid_spec=pltpu.PrefetchScalarGridSpec(
                num_scalar_prefetch=0,
                grid=(pl.cdiv(M, tm), H // tk),
                in_specs=[
                    pl.BlockSpec((tm, H), lambda i, k: (i, 0)),        # x rows (k-const)
                    pl.BlockSpec((H, tk), lambda i, k: (0, k)),        # w1 columns
                    pl.BlockSpec((1, tk), lambda i, k: (0, k)),        # b1 chunk
                    pl.BlockSpec((tk, H), lambda i, k: (k, 0)),        # w2 rows
                    pl.BlockSpec((1, H), lambda i, k: (0, 0), **wkw),  # b2 (grid-const)
                ],
                out_specs=pl.BlockSpec((tm, H), lambda i, k: (i, 0)),
                scratch_shapes=[pltpu.VMEM((tm, H), jnp.float32)],
            ),
            compiler_params=pltpu.CompilerParams(
                dimension_semantics=("parallel", "arbitrary"),
                vmem_limit_bytes=vmem_limit,
            ),
            cost_estimate=cost,
        )

    return _call_with_weight_buffering(build, (x2d, w1, b1f, w2, b2f))


# ----------------------------------------------------------------------------
# Public wrapper
# ----------------------------------------------------------------------------
def pointwise_feedforward(inputs, w1, b1, w2, b2, *, tm=None, mxu_bf16=True,
                          hidden_block=None):
    """Fused SASRec pointwise FFN: relu(x @ w1 + b1) @ w2 + b2 + x.

    inputs: (B, L, H).  w1, w2: (H, H) stored as [in, out] (PyTorch Conv1d
    weight (out, in, 1) squeezed and transposed).  b1, b2: (H,).
    Dropout is identity (eval-mode semantics).

    mxu_bf16: feed the MXU with bf16 operands (weights cast in the wrapper,
      activation tile cast in-kernel) while keeping f32 accumulation and a f32
      bias/ReLU/residual epilogue.  ~3-6x matmul throughput on v5e/v6e/v7x at a
      small precision deviation from the PyTorch f32 conv path; pass
      mxu_bf16=False for the bit-closer native-dtype route.
    hidden_block: multiple of 128 dividing H -> tile the intermediate hidden
      dim over a reduction grid axis instead of keeping both weights fully
      resident.  Chosen automatically when the resident footprint exceeds the
      per-generation VMEM budget (v7x at production H).
    """
    B, L, H = inputs.shape
    M = B * L
    x2d = inputs.reshape(M, H)

    if mxu_bf16:
        w1 = w1.astype(jnp.bfloat16)
        w2 = w2.astype(jnp.bfloat16)
    b1f = b1.reshape(1, H).astype(jnp.float32)
    b2f = b2.reshape(1, H).astype(jnp.float32)

    x_item = x2d.dtype.itemsize
    w_item = w1.dtype.itemsize

    vmem_cap = _vmem_capacity_bytes()
    vmem_budget = int(0.75 * vmem_cap)   # headroom for compiler scratch / spills

    # --- row tile (generation aware) ---
    if tm is None:
        tm = 1024 if vmem_cap >= (100 << 20) else 512    # v5e/v6e (128 MiB) : v7x
    tm = _round_up(max(int(tm), 16), 16)
    # Keep >= ~8 grid steps when M allows (both v7x TCs busy + pipeline depth),
    # but never below 256 rows (MXU fill) and never above the rounded row count.
    tm = min(tm, max(256, _round_up(pl.cdiv(M, 8), 16)))
    tm = min(tm, _round_up(M, 16))

    # --- resident-weights footprint vs. hidden-dim-tiled fallback ---
    n_wbuf = 1 if _single_buffer_kwargs() else 2
    resident_est = (n_wbuf * 2 * H * H * w_item
                    + 4 * tm * H * x_item
                    + 3 * tm * H * 4
                    + (2 << 20))
    if (hidden_block is None and resident_est > vmem_budget
            and H % 128 == 0 and H > 128):
        hidden_block = 512 if H % 512 == 0 else (256 if H % 256 == 0 else 128)
    if hidden_block is not None:
        hidden_block = int(hidden_block)
        if H % hidden_block != 0 or hidden_block % 128 != 0:
            raise ValueError(
                f"hidden_block={hidden_block} must be a multiple of 128 dividing H={H}")

    cost = pl.CostEstimate(
        flops=int(4 * M * H * H),
        transcendentals=0,
        bytes_accessed=int(2 * M * H * x_item + 2 * H * H * w_item + 8 * H),
    )

    if hidden_block is None:
        out2d = _resident_call(x2d, w1, b1f, b2f, w2, tm=tm,
                               vmem_budget=vmem_budget, cost=cost)
    else:
        out2d = _ktiled_call(x2d, w1, b1f, w2, b2f, tm=tm, tk=hidden_block,
                             vmem_budget=vmem_budget, cost=cost)
    return out2d.reshape(B, L, H)


# ----------------------------------------------------------------------------
# Self-test
# ----------------------------------------------------------------------------
if __name__ == "__main__":
    # Small shapes consistent with the module: batch=2, seq=8, hidden=32.
    B, L, H = 2, 8, 32
    key = jax.random.PRNGKey(0)
    k_x, k_w1, k_b1, k_w2, k_b2 = jax.random.split(key, 5)

    x = jax.random.normal(k_x, (B, L, H), dtype=jnp.float32)
    # Conv1d(H, H, kernel_size=1) weights are (out, in, 1); store as (in, out)
    # so that per-token matmul x @ W == conv over the transposed layout.
    bound = 1.0 / (H ** 0.5)
    w1 = jax.random.uniform(k_w1, (H, H), jnp.float32, -bound, bound)
    b1 = jax.random.uniform(k_b1, (H,), jnp.float32, -bound, bound)
    w2 = jax.random.uniform(k_w2, (H, H), jnp.float32, -bound, bound)
    b2 = jax.random.uniform(k_b2, (H,), jnp.float32, -bound, bound)

    ref = jnp.maximum(x @ w1 + b1, 0.0) @ w2 + b2 + x

    # 1) Native f32 MXU path (bit-closest to the PyTorch f32 conv reference).
    out_f32 = pointwise_feedforward(x, w1, b1, w2, b2, mxu_bf16=False)
    jax.block_until_ready(out_f32)
    assert out_f32.shape == (B, L, H)
    assert jnp.allclose(out_f32, ref, atol=1e-5, rtol=1e-5)

    # 2) Default path: bf16 MXU operands, f32 accumulation / epilogue.
    out_bf16mxu = pointwise_feedforward(x, w1, b1, w2, b2)
    jax.block_until_ready(out_bf16mxu)
    assert out_bf16mxu.shape == (B, L, H)
    assert jnp.allclose(out_bf16mxu, ref, atol=5e-2, rtol=5e-2)

    # 3) bf16 activations / weights end-to-end; loose tolerance.
    xb = x.astype(jnp.bfloat16)
    w1b, w2b = w1.astype(jnp.bfloat16), w2.astype(jnp.bfloat16)
    out_bf = pointwise_feedforward(xb, w1b, b1, w2b, b2)
    jax.block_until_ready(out_bf)
    xf, w1f, w2f = (xb.astype(jnp.float32), w1b.astype(jnp.float32),
                    w2b.astype(jnp.float32))
    ref_bf = jnp.maximum(xf @ w1f + b1, 0.0) @ w2f + b2 + xf
    assert out_bf.shape == (B, L, H)
    assert jnp.allclose(out_bf.astype(jnp.float32), ref_bf, atol=1e-1, rtol=1e-1)

    # 4) Hidden-dim-tiled fallback path (forced via hidden_block; this is the
    #    large-H / v7x route), still at small shapes.
    H2 = 256
    kx2, kw1b, kb1b, kw2b, kb2b = jax.random.split(jax.random.PRNGKey(1), 5)
    x2 = jax.random.normal(kx2, (B, L, H2), dtype=jnp.float32)
    bound2 = 1.0 / (H2 ** 0.5)
    w1_2 = jax.random.uniform(kw1b, (H2, H2), jnp.float32, -bound2, bound2)
    b1_2 = jax.random.uniform(kb1b, (H2,), jnp.float32, -bound2, bound2)
    w2_2 = jax.random.uniform(kw2b, (H2, H2), jnp.float32, -bound2, bound2)
    b2_2 = jax.random.uniform(kb2b, (H2,), jnp.float32, -bound2, bound2)
    ref2 = jnp.maximum(x2 @ w1_2 + b1_2, 0.0) @ w2_2 + b2_2 + x2
    out2 = pointwise_feedforward(x2, w1_2, b1_2, w2_2, b2_2,
                                 mxu_bf16=False, hidden_block=128)
    jax.block_until_ready(out2)
    assert out2.shape == (B, L, H2)
    assert jnp.allclose(out2, ref2, atol=2e-3, rtol=2e-3)

    print("KERNEL_OK")
</pallas_src>

<mosaic_0001>
module attributes {stable_mosaic.version = 11 : i64} {
  func.func @_ffn_kernel_resident(%arg0: i32, %arg1: memref<16x32xf32, #tpu.memory_space<vmem>>, %arg2: memref<32x32xf32, #tpu.memory_space<vmem>>, %arg3: memref<2x32xf32, #tpu.memory_space<vmem>>, %arg4: memref<32x32xf32, #tpu.memory_space<vmem>>, %arg5: memref<16x32xf32, #tpu.memory_space<vmem>>) attributes {dimension_semantics = [#tpu.dimension_semantics<parallel>], iteration_bounds = array<i64: 1>, scalar_prefetch = 0 : i64, scratch_operands = 0 : i64, tpu.core_type = #tpu.core_type<tc>, window_params = [{transform_indices = @transform_0, window_bounds = array<i64: 16, 32>}, {pipeline_mode = #tpu.pipeline_mode<synchronous>, transform_indices = @transform_1, window_bounds = array<i64: 32, 32>}, {pipeline_mode = #tpu.pipeline_mode<synchronous>, transform_indices = @transform_2, window_bounds = array<i64: 2, 32>}, {pipeline_mode = #tpu.pipeline_mode<synchronous>, transform_indices = @transform_3, window_bounds = array<i64: 32, 32>}, {transform_indices = @transform_4, window_bounds = array<i64: 16, 32>}]} {
    %c0 = arith.constant 0 : index
    %c0_0 = arith.constant 0 : index
    %0 = vector.load %arg1[%c0, %c0_0] : memref<16x32xf32, #tpu.memory_space<vmem>>, vector<16x32xf32>
    %c0_1 = arith.constant 0 : index
    %c0_2 = arith.constant 0 : index
    %1 = vector.load %arg2[%c0_1, %c0_2] : memref<32x32xf32, #tpu.memory_space<vmem>>, vector<32x32xf32>
    %cst = arith.constant dense<0.000000e+00> : vector<16x32xf32>
    %2 = tpu.matmul %0, %1, %cst {dimension_numbers = #tpu.dot_dimension_numbers<[1], [0], [0], [1], [0, 0, 1, 1], [], []>} : vector<16x32xf32>, vector<32x32xf32>, vector<16x32xf32> -> vector<16x32xf32>
    %c0_3 = arith.constant 0 : index
    %c0_4 = arith.constant 0 : index
    %3 = vector.load %arg3[%c0_3, %c0_4] : memref<2x32xf32, #tpu.memory_space<vmem>>, vector<1x32xf32>
    %4 = vector.broadcast %3 : vector<1x32xf32> to vector<16x32xf32>
    %5 = arith.addf %2, %4 : vector<16x32xf32>
    %cst_5 = arith.constant 0.000000e+00 : f32
    %6 = vector.broadcast %cst_5 : f32 to vector<16x32xf32>
    %7 = arith.maximumf %5, %6 : vector<16x32xf32>
    %c0_6 = arith.constant 0 : index
    %c0_7 = arith.constant 0 : index
    %8 = vector.load %arg4[%c0_6, %c0_7] : memref<32x32xf32, #tpu.memory_space<vmem>>, vector<32x32xf32>
    %cst_8 = arith.constant dense<0.000000e+00> : vector<16x32xf32>
    %9 = tpu.matmul %7, %8, %cst_8 {dimension_numbers = #tpu.dot_dimension_numbers<[1], [0], [0], [1], [0, 0, 1, 1], [], []>} : vector<16x32xf32>, vector<32x32xf32>, vector<16x32xf32> -> vector<16x32xf32>
    %c1 = arith.constant 1 : index
    %c0_9 = arith.constant 0 : index
    %10 = vector.load %arg3[%c1, %c0_9] : memref<2x32xf32, #tpu.memory_space<vmem>>, vector<1x32xf32>
    %11 = vector.broadcast %10 : vector<1x32xf32> to vector<16x32xf32>
    %12 = arith.addf %9, %11 : vector<16x32xf32>
    %c0_10 = arith.constant 0 : index
    %c0_11 = arith.constant 0 : index
    %13 = vector.load %arg1[%c0_10, %c0_11] : memref<16x32xf32, #tpu.memory_space<vmem>>, vector<16x32xf32>
    %14 = arith.addf %12, %13 : vector<16x32xf32>
    %c0_12 = arith.constant 0 : index
    %c0_13 = arith.constant 0 : index
    %15 = vector.load %arg5[%c0_12, %c0_13] : memref<16x32xf32, #tpu.memory_space<vmem>>, vector<16x32xf32>
    tpu.vector_store %arg5[%c0_12, %c0_13], %14 {strides = array<i32>} : memref<16x32xf32, #tpu.memory_space<vmem>>, vector<16x32xf32>,
    return
  }
  func.func @transform_0(%arg0: i32) -> (i32, i32) {
    %c0_i32 = arith.constant 0 : i32
    %c0_i32_0 = arith.constant 0 : i32
    return %arg0, %c0_i32 : i32, i32
  }
  func.func @transform_1(%arg0: i32) -> (i32, i32) {
    %c0_i32 = arith.constant 0 : i32
    %c0_i32_0 = arith.constant 0 : i32
    %c0_i32_1 = arith.constant 0 : i32
    return %c0_i32, %c0_i32_0 : i32, i32
  }
  func.func @transform_2(%arg0: i32) -> (i32, i32) {
    %c0_i32 = arith.constant 0 : i32
    %c0_i32_0 = arith.constant 0 : i32
    %c0_i32_1 = arith.constant 0 : i32
    return %c0_i32, %c0_i32_0 : i32, i32
  }
  func.func @transform_3(%arg0: i32) -> (i32, i32) {
    %c0_i32 = arith.constant 0 : i32
    %c0_i32_0 = arith.constant 0 : i32
    %c0_i32_1 = arith.constant 0 : i32
    return %c0_i32, %c0_i32_0 : i32, i32
  }
  func.func @transform_4(%arg0: i32) -> (i32, i32) {
    %c0_i32 = arith.constant 0 : i32
    %c0_i32_0 = arith.constant 0 : i32
    return %arg0, %c0_i32 : i32, i32
  }
}

module attributes {stable_mosaic.version = 11 : i64} {
  func.func @_ffn_kernel_resident(%arg0: i32, %arg1: memref<16x32xf32, #tpu.memory_space<vmem>>, %arg2: memref<32x32xf32, #tpu.memory_space<vmem>>, %arg3: memref<2x32xf32, #tpu.memory_space<vmem>>, %arg4: memref<32x32xf32, #tpu.memory_space<vmem>>, %arg5: memref<16x32xf32, #tpu.memory_space<vmem>>) attributes {dimension_semantics = [#tpu.dimension_semantics<parallel>], iteration_bounds = array<i64: 1>, scalar_prefetch = 0 : i64, scratch_operands = 0 : i64, tpu.core_type = #tpu.core_type<tc>, window_params = [{transform_indices = @transform_0, window_bounds = array<i64: 16, 32>}, {pipeline_mode = #tpu.pipeline_mode<synchronous>, transform_indices = @transform_1, window_bounds = array<i64: 32, 32>}, {pipeline_mode = #tpu.pipeline_mode<synchronous>, transform_indices = @transform_2, window_bounds = array<i64: 2, 32>}, {pipeline_mode = #tpu.pipeline_mode<synchronous>, transform_indices = @transform_3, window_bounds = array<i64: 32, 32>}, {transform_indices = @transform_4, window_bounds = array<i64: 16, 32>}]} {
    %c0 = arith.constant 0 : index
    %c0_0 = arith.constant 0 : index
    %0 = vector.load %arg1[%c0, %c0_0] : memref<16x32xf32, #tpu.memory_space<vmem>>, vector<16x32xf32>
    %c0_1 = arith.constant 0 : index
    %c0_2 = arith.constant 0 : index
    %1 = vector.load %arg2[%c0_1, %c0_2] : memref<32x32xf32, #tpu.memory_space<vmem>>, vector<32x32xf32>
    %cst = arith.constant dense<0.000000e+00> : vector<16x32xf32>
    %2 = tpu.matmul %0, %1, %cst {dimension_numbers = #tpu.dot_dimension_numbers<[1], [0], [0], [1], [0, 0, 1, 1], [], []>} : vector<16x32xf32>, vector<32x32xf32>, vector<16x32xf32> -> vector<16x32xf32>
    %c0_3 = arith.constant 0 : index
    %c0_4 = arith.constant 0 : index
    %3 = vector.load %arg3[%c0_3, %c0_4] : memref<2x32xf32, #tpu.memory_space<vmem>>, vector<1x32xf32>
    %4 = vector.broadcast %3 : vector<1x32xf32> to vector<16x32xf32>
    %5 = arith.addf %2, %4 : vector<16x32xf32>
    %cst_5 = arith.constant 0.000000e+00 : f32
    %6 = vector.broadcast %cst_5 : f32 to vector<16x32xf32>
    %7 = arith.maximumf %5, %6 : vector<16x32xf32>
    %c0_6 = arith.constant 0 : index
    %c0_7 = arith.constant 0 : index
    %8 = vector.load %arg4[%c0_6, %c0_7] : memref<32x32xf32, #tpu.memory_space<vmem>>, vector<32x32xf32>
    %cst_8 = arith.constant dense<0.000000e+00> : vector<16x32xf32>
    %9 = tpu.matmul %7, %8, %cst_8 {dimension_numbers = #tpu.dot_dimension_numbers<[1], [0], [0], [1], [0, 0, 1, 1], [], []>} : vector<16x32xf32>, vector<32x32xf32>, vector<16x32xf32> -> vector<16x32xf32>
    %c1 = arith.constant 1 : index
    %c0_9 = arith.constant 0 : index
    %10 = vector.load %arg3[%c1, %c0_9] : memref<2x32xf32, #tpu.memory_space<vmem>>, vector<1x32xf32>
    %11 = vector.broadcast %10 : vector<1x32xf32> to vector<16x32xf32>
    %12 = arith.addf %9, %11 : vector<16x32xf32>
    %c0_10 = arith.constant 0 : index
    %c0_11 = arith.constant 0 : index
    %13 = vector.load %arg1[%c0_10, %c0_11] : memref<16x32xf32, #tpu.memory_space<vmem>>, vector<16x32xf32>
    %14 = arith.addf %12, %13 : vector<16x32xf32>
    %c0_12 = arith.constant 0 : index
    %c0_13 = arith.constant 0 : index
    %15 = vector.load %arg5[%c0_12, %c0_13] : memref<16x32xf32, #tpu.memory_space<vmem>>, vector<16x32xf32>
    tpu.vector_store %arg5[%c0_12, %c0_13], %14 {strides = array<i32>} : memref<16x32xf32, #tpu.memory_space<vmem>>, vector<16x32xf32>,
    return
  }
  func.func @transform_0(%arg0: i32) -> (i32, i32) {
    %c0_i32 = arith.constant 0 : i32
    %c0_i32_0 = arith.constant 0 : i32
    return %arg0, %c0_i32 : i32, i32
  }
  func.func @transform_1(%arg0: i32) -> (i32, i32) {
    %c0_i32 = arith.constant 0 : i32
    %c0_i32_0 = arith.constant 0 : i32
    %c0_i32_1 = arith.constant 0 : i32
    return %c0_i32, %c0_i32_0 : i32, i32
  }
  func.func @transform_2(%arg0: i32) -> (i32, i32) {
    %c0_i32 = arith.constant 0 : i32
    %c0_i32_0 = arith.constant 0 : i32
    %c0_i32_1 = arith.constant 0 : i32
    return %c0_i32, %c0_i32_0 : i32, i32
  }
  func.func @transform_3(%arg0: i32) -> (i32, i32) {
    %c0_i32 = arith.constant 0 : i32
    %c0_i32_0 = arith.constant 0 : i32
    %c0_i32_1 = arith.constant 0 : i32
    return %c0_i32, %c0_i32_0 : i32, i32
  }
  func.func @transform_4(%arg0: i32) -> (i32, i32) {
    %c0_i32 = arith.constant 0 : i32
    %c0_i32_0 = arith.constant 0 : i32
    return %arg0, %c0_i32 : i32, i32
  }
}

</mosaic_0001>

<bundles_post_ra>
// kernel: tpu_custom_call.1
= control target key start
LH: loop header
LB: loop body
LE: loop exit
PB: predicated region body
PF: predicated region fallthrough
CT: control target
= control target key end

     0   :  { %9 = vsyncpa [#allocation3], 0  ;;  %s465_s0 = inlined_call_operand.hbm [shape: f32[16,32], index: 0, kind: input, shape index: {}]   ;;  %s466_s1 = inlined_call_operand.hbm [shape: f32[32,32], index: 1, kind: input, shape index: {}]   ;;  %s467_s2 = inlined_call_operand.vmem [shape: f32[2,32], index: 2, kind: input, shape index: {}]   ;;  %s468_s3 = inlined_call_operand.hbm [shape: f32[32,32], index: 3, kind: input, shape index: {}]   ;;  %s469_s4 = inlined_call_operand.hbm [shape: f32[16,32], index: 4, kind: output, shape index: {}]  }
   0x1   :  { %10 = vsyncpa [#allocation6], 0 }
   0x2   :  { %11 = vsyncpa [#allocation4], 0  ;;  %s398_s15 = smov [#allocation5]   ;;  %s399_s17 = smov [#allocation2]  }
   0x3   :  { %s29_s16 = sshll.u32 %s398_s15, 4  ;;  %s17_s18 = sshll.u32 %s399_s17, 4  ;;  %s30_s16 = int_to_ptr.vmem [resolvable:$true] %s29_s16  ;;  %s18_s18 = int_to_ptr.vmem [resolvable:$true] %s17_s18 }
   0x4   :  { %s320_s19 = scalar_lea.vmem %s30_s16, 512  ;;  %p325_p1 = scmp.lt.s32.totalorder %s30_s16, %s30_s16 }
   0x5   :  { %p321_p0 = scmp.ne.s32.totalorder %s30_s16, %s320_s19  ;;  %p326_p2 = scmp.lt.s32.totalorder %s320_s19, %s320_s19 }
   0x7   :  { %p327_p3 = por %p326_p2, %p325_p1 }
   0x9   :  { %p328_p4 = pnand %p327_p3, %p321_p0 }
   0xb   :  { %331 = shalt.err (!%p328_p4)
}
   0xc   :  { %s400_s20 = smov 128   ;;  %s401_s21 = smov 8  }
   0xd   :  { %35 = dma.hbm_to_vmem [thread:$0]  %s466_s1, 512, %s30_s16, [#allocation6], %s400_s20, %s400_s20, %s401_s21  }
   0xe   :  { %s340_s24 = scalar_lea.vmem %s18_s18, 256  ;;  %p345_p6 = scmp.lt.s32.totalorder %s18_s18, %s18_s18 }
   0xf   :  { %p341_p5 = scmp.ne.s32.totalorder %s18_s18, %s340_s24  ;;  %p346_p7 = scmp.lt.s32.totalorder %s340_s24, %s340_s24 }
  0x11   :  { %p347_p8 = por %p346_p7, %p345_p6 }
  0x13   :  { %p348_p9 = pnand %p347_p8, %p341_p5 }
  0x15   :  { %351 = shalt.err (!%p348_p9)
}
  0x16   :  { %23 = dma.hbm_to_vmem [thread:$0]  %s465_s0, 256, %s18_s18, [#allocation3], %s400_s20, %s400_s20, %s401_s21  }
  0x17   :  { %s402_s27 = smov [#allocation7]  }
  0x18   :  { %s43_s28 = sshll.u32 %s402_s27, 4  ;;  %s44_s28 = int_to_ptr.vmem [resolvable:$true] %s43_s28 }
  0x19   :  { %s360_s29 = scalar_lea.vmem %s44_s28, 512  ;;  %p365_p11 = scmp.lt.s32.totalorder %s44_s28, %s44_s28 }
  0x1a   :  { %p361_p10 = scmp.ne.s32.totalorder %s44_s28, %s360_s29  ;;  %p366_p12 = scmp.lt.s32.totalorder %s360_s29, %s360_s29 }
  0x1c   :  { %p367_p13 = por %p366_p12, %p365_p11 }
  0x1e   :  { %p368_p0 = pnand %p367_p13, %p361_p10 }
  0x20   :  { %371 = shalt.err (!%p368_p0)
}
  0x21   :  { %49 = dma.hbm_to_vmem [thread:$0]  %s468_s3, 512, %s44_s28, [#allocation6], %s400_s20, %s400_s20, %s401_s21  }
  0x22   :  { %392 = dma.done.wait [#allocation3], 256  }
  0x23   :  { %393 = vsyncadd [#allocation3], 4294967040 }
  0x24   :  { %394 = dma.done.wait [#allocation6], 1024  }
  0x25   :  { %395 = vsyncadd [#allocation6], 4294966272  ;;  %vm70_vm0 = vcmask 261120   ;;  %v64_v0 = vld [vmem:[#allocation5 + $0x18] sm:$0xff]  ;;  %v63_v1 = vld [vmem:[#allocation5 + $0x10] sm:$0xff]  ;;  %s403_s7 = smov [#allocation8]  }
  0x26   :  { %284 = vmatprep.subr.mxu0 %v64_v0  ;;  %v59_v2 = vld [vmem:[#allocation2] sm:$0xff]  ;;  %v62_v3 = vld [vmem:[#allocation5 + $0x8] sm:$0xff]  ;;  %v61_v4 = vld [vmem:[#allocation5] sm:$0xff]  ;;  %s253_s8 = sshll.u32 %s403_s7, 4  ;;  %s254_s8 = int_to_ptr.vmem [resolvable:$true] %s253_s8 }
  0x27   :  { %285 = vmatpush3.msra.mxu0 %v64_v0  ;;  %292 = vmatprep.mubr.msk.f32.mxu0 %vm70_vm0, %v59_v2  ;;  %v60_v5 = vld [vmem:[#allocation2 + $0x8] sm:$0xff]  ;;  %v156_v7 = vld [vmem:[#allocation7 + $0x10] sm:$0xff]  ;;  %v155_v8 = vld [vmem:[#allocation7 + $0x8] sm:$0xff]  ;;  %s372_s9 = scalar_lea.vmem %s254_s8, 256  ;;  %p377_p2 = scmp.lt.s32.totalorder %s254_s8, %s254_s8 }
  0x28   :  { %286 = vmatprep.subr.mxu0 %v63_v1  ;;  %v157_v6 = vld [vmem:[#allocation7 + $0x18] sm:$0xff]  ;;  %v154_v9 = vld [vmem:[#allocation7] sm:$0xff]  ;;  %v266_v10 = vld [vmem:[%s467_s2] ss:$0 sm:$0xff]  ;;  %p373_p1 = scmp.ne.s32.totalorder %s254_s8, %s372_s9  ;;  %p378_p3 = scmp.lt.s32.totalorder %s372_s9, %s372_s9 }
  0x29   :  { %287 = vmatpush3.msra.mxu0 %v63_v1  ;;  %295 = vmatprep.subr.mxu1 %v157_v6  ;;  %v269_v17 = vld [vmem:[%s467_s2 + $0x1] ss:$0 sm:$0xff] }
  0x2a   :  { %288 = vmatprep.subr.mxu0 %v62_v3  ;;  %296 = vmatpush3.msra.mxu1 %v157_v6  ;;  %p379_p4 = por %p378_p3, %p377_p2 }
  0x2b   :  { %289 = vmatpush3.msra.mxu0 %v62_v3  ;;  %297 = vmatprep.subr.mxu1 %v156_v7 }
  0x2c   :  { %290 = vmatprep.subr.mxu0 %v61_v4  ;;  %298 = vmatpush3.msra.mxu1 %v156_v7  ;;  %p380_p5 = pnand %p379_p4, %p373_p1 }
  0x2d   :  { %291 = vmatpush3.msra.mxu0 %v61_v4  ;;  %299 = vmatprep.subr.mxu1 %v155_v8 }
  0x2e   :  { %293 = vmatmul.mubr.msk.f32.vlgmr.msra.gmra.mxu0 %vm70_vm0, %v60_v5  ;;  %300 = vmatpush3.msra.mxu1 %v155_v8 }
  0x2f   :  { %301 = vmatprep.subr.mxu1 %v154_v9 }
  0x30   :  { %302 = vmatpush3.msra.mxu1 %v154_v9 }
  0xee   :  { %v294_v11 = vpop.f32.mrf.mxu0 }
  0xef   :  { %v149_v12 = vadd.f32 %v294_v11, %v266_v10 }
  0xf0   :  { %v143_v13 = vpop.f32.mrf.mxu0 }
  0xf1   :  { %v144_v14 = vadd.f32 %v266_v10, %v143_v13  ;;  %v153_v16 = vmax.f32 %v149_v12, 0.0 }
  0xf3   :  { %v152_v15 = vmax.f32 %v144_v14, 0.0 }
  0xf5   :  { %303 = vmatprep.mubr.msk.f32.mxu1 %vm70_vm0, %v152_v15 }
  0xf6   :  { %304 = vmatmul.mubr.msk.f32.vlgmr.msra.gmra.mxu1 %vm70_vm0, %v153_v16 }
 0x1b6   :  { %v305_v18 = vpop.f32.mrf.mxu1 }
 0x1b7   :  { %v241_v19 = vadd.f32 %v305_v18, %v269_v17 }
 0x1b8   :  { %v235_v20 = vpop.f32.mrf.mxu1 }
 0x1b9   :  { %v245_v21 = vadd.f32 %v241_v19, %v60_v5  ;;  %v236_v22 = vadd.f32 %v269_v17, %v235_v20 }
 0x1bb   :  { %247 = vst.msk [vmem:[#allocation8 + $0x8] sm:$0xff] %vm70_vm0, %v245_v21  ;;  %v244_v23 = vadd.f32 %v236_v22, %v59_v2 }
 0x1bd   :  { %246 = vst.msk [vmem:[#allocation8] sm:$0xff] %vm70_vm0, %v244_v23 }
 0x1be   :  { %383 = shalt.err (!%p380_p5)
}
 0x1bf   :  { %259 = dma.vmem_to_hbm [thread:$0]  %s254_s8, 256, %s469_s4, [#allocation4], %s400_s20, %s400_s20, %s401_s21  }
 0x1c0   :  { %396 = dma.done.wait [#allocation4], 256  }
 0x1c1   :  { %397 = vsyncadd [#allocation4], 4294967040 }
 0x1c2   :  { %263 = vsyncpa [#allocation3], 1 }
 0x1c3   :  { %264 = vsyncpa [#allocation6], 1 }
 0x1c4   :  { %265 = vsyncpa [#allocation4], 1 }

// kernel: tpu_custom_call.1
= control target key start
LH: loop header
LB: loop body
LE: loop exit
PB: predicated region body
PF: predicated region fallthrough
CT: control target
= control target key end

     0   :  { %9 = vsyncpa [#allocation3], 0  ;;  %s465_s0 = inlined_call_operand.hbm [shape: f32[16,32], index: 0, kind: input, shape index: {}]   ;;  %s466_s1 = inlined_call_operand.hbm [shape: f32[32,32], index: 1, kind: input, shape index: {}]   ;;  %s467_s2 = inlined_call_operand.vmem [shape: f32[2,32], index: 2, kind: input, shape index: {}]   ;;  %s468_s3 = inlined_call_operand.hbm [shape: f32[32,32], index: 3, kind: input, shape index: {}]   ;;  %s469_s4 = inlined_call_operand.hbm [shape: f32[16,32], index: 4, kind: output, shape index: {}]  }
   0x1   :  { %10 = vsyncpa [#allocation6], 0 }
   0x2   :  { %11 = vsyncpa [#allocation4], 0  ;;  %s398_s15 = smov [#allocation5]   ;;  %s399_s17 = smov [#allocation2]  }
   0x3   :  { %s29_s16 = sshll.u32 %s398_s15, 4  ;;  %s17_s18 = sshll.u32 %s399_s17, 4  ;;  %s30_s16 = int_to_ptr.vmem [resolvable:$true] %s29_s16  ;;  %s18_s18 = int_to_ptr.vmem [resolvable:$true] %s17_s18 }
   0x4   :  { %s320_s19 = scalar_lea.vmem %s30_s16, 512  ;;  %p325_p1 = scmp.lt.s32.totalorder %s30_s16, %s30_s16 }
   0x5   :  { %p321_p0 = scmp.ne.s32.totalorder %s30_s16, %s320_s19  ;;  %p326_p2 = scmp.lt.s32.totalorder %s320_s19, %s320_s19 }
   0x7   :  { %p327_p3 = por %p326_p2, %p325_p1 }
   0x9   :  { %p328_p4 = pnand %p327_p3, %p321_p0 }
   0xb   :  { %331 = shalt.err (!%p328_p4)
}
   0xc   :  { %s400_s20 = smov 128   ;;  %s401_s21 = smov 8  }
   0xd   :  { %35 = dma.hbm_to_vmem [thread:$0]  %s466_s1, 512, %s30_s16, [#allocation6], %s400_s20, %s400_s20, %s401_s21  }
   0xe   :  { %s340_s24 = scalar_lea.vmem %s18_s18, 256  ;;  %p345_p6 = scmp.lt.s32.totalorder %s18_s18, %s18_s18 }
   0xf   :  { %p341_p5 = scmp.ne.s32.totalorder %s18_s18, %s340_s24  ;;  %p346_p7 = scmp.lt.s32.totalorder %s340_s24, %s340_s24 }
  0x11   :  { %p347_p8 = por %p346_p7, %p345_p6 }
  0x13   :  { %p348_p9 = pnand %p347_p8, %p341_p5 }
  0x15   :  { %351 = shalt.err (!%p348_p9)
}
  0x16   :  { %23 = dma.hbm_to_vmem [thread:$0]  %s465_s0, 256, %s18_s18, [#allocation3], %s400_s20, %s400_s20, %s401_s21  }
  0x17   :  { %s402_s27 = smov [#allocation7]  }
  0x18   :  { %s43_s28 = sshll.u32 %s402_s27, 4  ;;  %s44_s28 = int_to_ptr.vmem [resolvable:$true] %s43_s28 }
  0x19   :  { %s360_s29 = scalar_lea.vmem %s44_s28, 512  ;;  %p365_p11 = scmp.lt.s32.totalorder %s44_s28, %s44_s28 }
  0x1a   :  { %p361_p10 = scmp.ne.s32.totalorder %s44_s28, %s360_s29  ;;  %p366_p12 = scmp.lt.s32.totalorder %s360_s29, %s360_s29 }
  0x1c   :  { %p367_p13 = por %p366_p12, %p365_p11 }
  0x1e   :  { %p368_p0 = pnand %p367_p13, %p361_p10 }
  0x20   :  { %371 = shalt.err (!%p368_p0)
}
  0x21   :  { %49 = dma.hbm_to_vmem [thread:$0]  %s468_s3, 512, %s44_s28, [#allocation6], %s400_s20, %s400_s20, %s401_s21  }
  0x22   :  { %392 = dma.done.wait [#allocation3], 256  }
  0x23   :  { %393 = vsyncadd [#allocation3], 4294967040 }
  0x24   :  { %394 = dma.done.wait [#allocation6], 1024  }
  0x25   :  { %395 = vsyncadd [#allocation6], 4294966272  ;;  %vm70_vm0 = vcmask 261120   ;;  %v64_v0 = vld [vmem:[#allocation5 + $0x18] sm:$0xff]  ;;  %v63_v1 = vld [vmem:[#allocation5 + $0x10] sm:$0xff]  ;;  %s403_s7 = smov [#allocation8]  }
  0x26   :  { %284 = vmatprep.subr.mxu0 %v64_v0  ;;  %v59_v2 = vld [vmem:[#allocation2] sm:$0xff]  ;;  %v62_v3 = vld [vmem:[#allocation5 + $0x8] sm:$0xff]  ;;  %v61_v4 = vld [vmem:[#allocation5] sm:$0xff]  ;;  %s253_s8 = sshll.u32 %s403_s7, 4  ;;  %s254_s8 = int_to_ptr.vmem [resolvable:$true] %s253_s8 }
  0x27   :  { %285 = vmatpush3.msra.mxu0 %v64_v0  ;;  %292 = vmatprep.mubr.msk.f32.mxu0 %vm70_vm0, %v59_v2  ;;  %v60_v5 = vld [vmem:[#allocation2 + $0x8] sm:$0xff]  ;;  %v156_v7 = vld [vmem:[#allocation7 + $0x10] sm:$0xff]  ;;  %v155_v8 = vld [vmem:[#allocation7 + $0x8] sm:$0xff]  ;;  %s372_s9 = scalar_lea.vmem %s254_s8, 256  ;;  %p377_p2 = scmp.lt.s32.totalorder %s254_s8, %s254_s8 }
  0x28   :  { %286 = vmatprep.subr.mxu0 %v63_v1  ;;  %v157_v6 = vld [vmem:[#allocation7 + $0x18] sm:$0xff]  ;;  %v154_v9 = vld [vmem:[#allocation7] sm:$0xff]  ;;  %v266_v10 = vld [vmem:[%s467_s2] ss:$0 sm:$0xff]  ;;  %p373_p1 = scmp.ne.s32.totalorder %s254_s8, %s372_s9  ;;  %p378_p3 = scmp.lt.s32.totalorder %s372_s9, %s372_s9 }
  0x29   :  { %287 = vmatpush3.msra.mxu0 %v63_v1  ;;  %295 = vmatprep.subr.mxu1 %v157_v6  ;;  %v269_v17 = vld [vmem:[%s467_s2 + $0x1] ss:$0 sm:$0xff] }
  0x2a   :  { %288 = vmatprep.subr.mxu0 %v62_v3  ;;  %296 = vmatpush3.msra.mxu1 %v157_v6  ;;  %p379_p4 = por %p378_p3, %p377_p2 }
  0x2b   :  { %289 = vmatpush3.msra.mxu0 %v62_v3  ;;  %297 = vmatprep.subr.mxu1 %v156_v7 }
  0x2c   :  { %290 = vmatprep.subr.mxu0 %v61_v4  ;;  %298 = vmatpush3.msra.mxu1 %v156_v7  ;;  %p380_p5 = pnand %p379_p4, %p373_p1 }
  0x2d   :  { %291 = vmatpush3.msra.mxu0 %v61_v4  ;;  %299 = vmatprep.subr.mxu1 %v155_v8 }
  0x2e   :  { %293 = vmatmul.mubr.msk.f32.vlgmr.msra.gmra.mxu0 %vm70_vm0, %v60_v5  ;;  %300 = vmatpush3.msra.mxu1 %v155_v8 }
  0x2f   :  { %301 = vmatprep.subr.mxu1 %v154_v9 }
  0x30   :  { %302 = vmatpush3.msra.mxu1 %v154_v9 }
  0xee   :  { %v294_v11 = vpop.f32.mrf.mxu0 }
  0xef   :  { %v149_v12 = vadd.f32 %v294_v11, %v266_v10 }
  0xf0   :  { %v143_v13 = vpop.f32.mrf.mxu0 }
  0xf1   :  { %v144_v14 = vadd.f32 %v266_v10, %v143_v13  ;;  %v153_v16 = vmax.f32 %v149_v12, 0.0 }
  0xf3   :  { %v152_v15 = vmax.f32 %v144_v14, 0.0 }
  0xf5   :  { %303 = vmatprep.mubr.msk.f32.mxu1 %vm70_vm0, %v152_v15 }
  0xf6   :  { %304 = vmatmul.mubr.msk.f32.vlgmr.msra.gmra.mxu1 %vm70_vm0, %v153_v16 }
 0x1b6   :  { %v305_v18 = vpop.f32.mrf.mxu1 }
 0x1b7   :  { %v241_v19 = vadd.f32 %v305_v18, %v269_v17 }
 0x1b8   :  { %v235_v20 = vpop.f32.mrf.mxu1 }
 0x1b9   :  { %v245_v21 = vadd.f32 %v241_v19, %v60_v5  ;;  %v236_v22 = vadd.f32 %v269_v17, %v235_v20 }
 0x1bb   :  { %247 = vst.msk [vmem:[#allocation8 + $0x8] sm:$0xff] %vm70_vm0, %v245_v21  ;;  %v244_v23 = vadd.f32 %v236_v22, %v59_v2 }
 0x1bd   :  { %246 = vst.msk [vmem:[#allocation8] sm:$0xff] %vm70_vm0, %v244_v23 }
 0x1be   :  { %383 = shalt.err (!%p380_p5)
}
 0x1bf   :  { %259 = dma.vmem_to_hbm [thread:$0]  %s254_s8, 256, %s469_s4, [#allocation4], %s400_s20, %s400_s20, %s401_s21  }
 0x1c0   :  { %396 = dma.done.wait [#allocation4], 256  }
 0x1c1   :  { %397 = vsyncadd [#allocation4], 4294967040 }
 0x1c2   :  { %263 = vsyncpa [#allocation3], 1 }
 0x1c3   :  { %264 = vsyncpa [#allocation6], 1 }
 0x1c4   :  { %265 = vsyncpa [#allocation4], 1 }

</bundles_post_ra>
